<compile_context>
chip_gen: v7x
topology: tpu7x:2x2x1
jax: 0.10.0
libtpu: 0.0.40
codegen_flags: <defaults>
</compile_context>

<pallas_src>
import jax
import jax.numpy as jnp
from jax.experimental import pallas as pl
from jax.experimental.pallas import tpu as pltpu

_MiB = 1 << 20


def _cdiv(a, b):
    return (a + b - 1) // b


def _round_up(a, b):
    return _cdiv(a, b) * b


# ---------------------------------------------------------------------------
# Kernel
# ---------------------------------------------------------------------------
def mlp_kernel(x_ref, w1_ref, b1_ref, w2_ref, b2_ref, o_ref):
    # x_ref : (TB, IN)        f32  (cast to bf16 on the VPU, a free slot)
    # w1_ref: (IN, H)         bf16 (resident, single-buffered)
    # b1_ref: (1, H)          f32
    # w2_ref: (H, OUT_PAD)    bf16 (padded cols are 0)
    # b2_ref: (1, OUT_PAD)    f32  (padded cols are -1e30 -> exp underflows to 0)
    # o_ref : (TB, OUT_PAD)   f32  lane-dense 128-wide unmasked stores
    x_bf = x_ref[...].astype(jnp.bfloat16)
    h = jnp.dot(x_bf, w1_ref[...], preferred_element_type=jnp.float32)
    h = jnp.maximum(h + b1_ref[...], 0.0)                       # ReLU in f32

    # NOTE: h is re-quantized to bf16 for the second MXU pass (f32 accumulate).
    logits = jnp.dot(h.astype(jnp.bfloat16), w2_ref[...],
                     preferred_element_type=jnp.float32) + b2_ref[...]

    # Softmax over the feature axis (padded lanes contribute exactly 0).
    m = jnp.max(logits, axis=-1, keepdims=True)
    e = jnp.exp(logits - m)
    denom = jnp.sum(e, axis=-1, keepdims=True)
    o_ref[...] = (e * pl.reciprocal(denom, approx=True)).astype(o_ref.dtype)


# ---------------------------------------------------------------------------
# Chip-aware sizing helpers
# ---------------------------------------------------------------------------
def _tpu_config():
    """Returns (num_tensorcores, vmem_budget_bytes, vmem_limit_cap_bytes)."""
    try:
        kind = jax.devices()[0].device_kind.lower()
    except Exception:
        kind = ""
    if "v7" in kind:
        # v7x: 64 MiB VMEM per TensorCore, 2 TCs per chip.
        return 2, 44 * _MiB, 56 * _MiB
    if any(g in kind for g in ("v4", "v5", "v6")):
        # v5e / v6e (and v4/v5p): 128 MiB VMEM, 1 TC per chip sees the grid.
        return 1, 88 * _MiB, 104 * _MiB
    # Unknown chip: be conservative (v7x-like budget).
    return 1, 44 * _MiB, 56 * _MiB


def _weights_bytes(in_size, hidden, out_pad):
    return (in_size * hidden + hidden * out_pad) * 2 + (hidden + out_pad) * 4


def _per_row_bytes(in_size, hidden, out_pad):
    # x f32 (double-buffered) + out f32 (double-buffered) + in-kernel
    # intermediates (bf16 x copy, h f32 + h bf16, logits/exp f32).
    return (2 * in_size * 4 + 2 * out_pad * 4
            + in_size * 2 + hidden * 6 + out_pad * 8)


def _vmem_bytes(tile_b, in_size, hidden, out_pad):
    return (_weights_bytes(in_size, hidden, out_pad)
            + tile_b * _per_row_bytes(in_size, hidden, out_pad))


def _pick_tile_b(B, in_size, hidden, out_pad, num_tc, vmem_budget):
    """Batch tile: one grid step for small B on 1-TC chips; 256/512-row
    MXU-granular tiles capped by the VMEM budget otherwise, with >= num_tc
    grid steps so v7x's second TensorCore gets a batch shard."""
    weights = _weights_bytes(in_size, hidden, out_pad)
    per_row = _per_row_bytes(in_size, hidden, out_pad)
    avail = vmem_budget - weights
    if avail < 8 * per_row:
        # TODO(synk): K-tile the first matmul (stream W1 over an in_size grid
        # axis with an f32 accumulator) once the resident weights alone blow
        # the VMEM budget (v7x with in*hidden >~ 4096^2); minimal tile for now.
        return 8
    cap = (avail // per_row) // 8 * 8

    b8 = _round_up(B, 8)
    single_step_limit = 256 if num_tc > 1 else 512
    if b8 <= min(single_step_limit, cap):
        return b8                                   # one step, zero loop overhead

    tile = min(512, cap)
    tile = (tile // 256) * 256 if tile >= 256 else (tile // 8) * 8
    # v7x: guarantee at least one batch shard per TensorCore.
    while num_tc > 1 and _cdiv(b8, tile) < num_tc and tile > 8:
        tile = max(8, _round_up(tile // 2, 8))
    return max(8, tile)


# ---------------------------------------------------------------------------
# Forward wrapper
# ---------------------------------------------------------------------------
def mlp_forward(x, w1, b1, w2, b2, *, tile_b=None):
    """x: (B, C, H, W) or (B, input_size). Returns (B, out_size) softmax probs."""
    B = x.shape[0]
    x2d = x.reshape(B, -1).astype(jnp.float32)   # x.view(x.size(0), -1); no bf16 pass
    in_size = x2d.shape[1]
    hidden = w1.shape[1]
    out_size = w2.shape[1]
    out_pad = max(128, _round_up(out_size, 128))  # lane-dense output width

    # bf16 MXU weights (halves weight HBM/VMEM); biases stay f32.
    # TODO(synk): optional fp8 weights (+ per-channel scales) on v7x only.
    w1_bf = w1.astype(jnp.bfloat16)
    w2_pad = jnp.zeros((hidden, out_pad), jnp.bfloat16)
    w2_pad = w2_pad.at[:, :out_size].set(w2.astype(jnp.bfloat16))
    b1_f = b1.reshape(1, hidden).astype(jnp.float32)
    b2_pad = jnp.full((1, out_pad), -1e30, jnp.float32)
    b2_pad = b2_pad.at[:, :out_size].set(b2.reshape(-1).astype(jnp.float32))

    num_tc, vmem_budget, vmem_cap = _tpu_config()
    if tile_b is None:
        tile_b = _pick_tile_b(B, in_size, hidden, out_pad, num_tc, vmem_budget)
    tile_b = max(8, _round_up(tile_b, 8))
    grid = (pl.cdiv(B, tile_b),)                  # ragged last block handled by Pallas

    need = _vmem_bytes(tile_b, in_size, hidden, out_pad)
    vmem_limit = int(min(vmem_cap, max(32 * _MiB, 2 * need)))

    def _build(single_buffer_weights):
        resident = ({"pipeline_mode": pl.Buffered(1)}
                    if single_buffer_weights else {})
        in_specs = [
            pl.BlockSpec((tile_b, in_size), lambda i: (i, 0)),                # x tile (streamed)
            pl.BlockSpec((in_size, hidden), lambda i: (0, 0), **resident),    # W1 (resident)
            pl.BlockSpec((1, hidden), lambda i: (0, 0), **resident),          # b1
            pl.BlockSpec((hidden, out_pad), lambda i: (0, 0), **resident),    # W2 (padded)
            pl.BlockSpec((1, out_pad), lambda i: (0, 0), **resident),         # b2 (padded)
        ]
        return pl.pallas_call(
            mlp_kernel,
            out_shape=jax.ShapeDtypeStruct((B, out_pad), jnp.float32),
            grid_spec=pltpu.PrefetchScalarGridSpec(
                num_scalar_prefetch=0,
                grid=grid,
                in_specs=in_specs,
                out_specs=pl.BlockSpec((tile_b, out_pad), lambda i: (i, 0)),
            ),
            # Batch axis is embarrassingly parallel -> v7x megacore shards it.
            compiler_params=pltpu.CompilerParams(
                dimension_semantics=("parallel",),
                vmem_limit_bytes=vmem_limit,
            ),
        )

    try:
        out = _build(True)(x2d, w1_bf, b1_f, w2_pad, b2_pad)
    except Exception:
        # Fallback for builds where Buffered(1) on resident operands is not
        # accepted: identical kernel with default double-buffered weight specs.
        out = _build(False)(x2d, w1_bf, b1_f, w2_pad, b2_pad)

    return out[:, :out_size]


# ---------------------------------------------------------------------------
# Param init (mimics nn.Linear: uniform +/- 1/sqrt(fan_in)), stored as W.T
# ---------------------------------------------------------------------------
def init_params(key, input_size, hidden_size, out_size=6):
    k1, k2, k3, k4 = jax.random.split(key, 4)
    bound1 = 1.0 / (input_size ** 0.5)
    bound2 = 1.0 / (hidden_size ** 0.5)
    w1 = jax.random.uniform(k1, (input_size, hidden_size), jnp.float32,
                            -bound1, bound1)
    b1 = jax.random.uniform(k2, (1, hidden_size), jnp.float32, -bound1, bound1)
    w2 = jax.random.uniform(k3, (hidden_size, out_size), jnp.float32,
                            -bound2, bound2)
    b2 = jax.random.uniform(k4, (1, out_size), jnp.float32, -bound2, bound2)
    return w1, b1, w2, b2


if __name__ == "__main__":
    key = jax.random.PRNGKey(0)
    kx, kp = jax.random.split(key)

    # Small shapes consistent with the module: batch=8, input flattens to 32.
    B, C, H, W = 8, 2, 4, 4
    input_size = C * H * W          # 32
    hidden_size = 32
    out_size = 6

    x = jax.random.normal(kx, (B, C, H, W), jnp.float32)
    w1, b1, w2, b2 = init_params(kp, input_size, hidden_size, out_size)

    out = mlp_forward(x, w1, b1, w2, b2)
    out = jax.block_until_ready(out)
    assert out.shape == (B, out_size)

    # Reference with the same bf16-operand / f32-accumulate matmul recipe.
    x2d = x.reshape(B, -1)
    h_ref = jnp.maximum(
        jnp.dot(x2d.astype(jnp.bfloat16), w1.astype(jnp.bfloat16),
                preferred_element_type=jnp.float32) + b1, 0.0)
    logits_ref = jnp.dot(h_ref.astype(jnp.bfloat16), w2.astype(jnp.bfloat16),
                         preferred_element_type=jnp.float32) + b2
    ref_bf16 = jax.nn.softmax(logits_ref, axis=1)
    # approx=True reciprocal in the softmax -> allow a little slack.
    assert jnp.allclose(out, ref_bf16, atol=2e-3, rtol=2e-3)

    # Sanity vs. a pure-f32 reference (bf16 operand rounding only).
    logits_f32 = jnp.maximum(x2d @ w1 + b1, 0.0) @ w2 + b2
    ref_f32 = jax.nn.softmax(logits_f32, axis=1)
    assert jnp.allclose(out, ref_f32, atol=3e-2, rtol=3e-2)
    assert jnp.allclose(jnp.sum(out, axis=1), 1.0, atol=5e-3)

    print("KERNEL_OK")
</pallas_src>

<mosaic_0001>
module attributes {stable_mosaic.version = 11 : i64} {
  func.func @mlp_kernel(%arg0: i32, %arg1: memref<8x32xf32, #tpu.memory_space<vmem>>, %arg2: memref<32x32xbf16, #tpu.memory_space<vmem>>, %arg3: memref<1x32xf32, #tpu.memory_space<vmem>>, %arg4: memref<32x128xbf16, #tpu.memory_space<vmem>>, %arg5: memref<1x128xf32, #tpu.memory_space<vmem>>, %arg6: memref<8x128xf32, #tpu.memory_space<vmem>>) attributes {dimension_semantics = [#tpu.dimension_semantics<parallel>], iteration_bounds = array<i64: 1>, scalar_prefetch = 0 : i64, scratch_operands = 0 : i64, tpu.core_type = #tpu.core_type<tc>, window_params = [{transform_indices = @transform_0, window_bounds = array<i64: 8, 32>}, {pipeline_mode = #tpu.pipeline_mode<synchronous>, transform_indices = @transform_1, window_bounds = array<i64: 32, 32>}, {pipeline_mode = #tpu.pipeline_mode<synchronous>, transform_indices = @transform_2, window_bounds = array<i64: 1, 32>}, {pipeline_mode = #tpu.pipeline_mode<synchronous>, transform_indices = @transform_3, window_bounds = array<i64: 32, 128>}, {pipeline_mode = #tpu.pipeline_mode<synchronous>, transform_indices = @transform_4, window_bounds = array<i64: 1, 128>}, {transform_indices = @transform_5, window_bounds = array<i64: 8, 128>}]} {
    %c0 = arith.constant 0 : index
    %c0_0 = arith.constant 0 : index
    %0 = vector.load %arg1[%c0, %c0_0] : memref<8x32xf32, #tpu.memory_space<vmem>>, vector<8x32xf32>
    %1 = arith.truncf %0 : vector<8x32xf32> to vector<8x32xbf16>
    %c0_1 = arith.constant 0 : index
    %c0_2 = arith.constant 0 : index
    %2 = vector.load %arg2[%c0_1, %c0_2] : memref<32x32xbf16, #tpu.memory_space<vmem>>, vector<32x32xbf16>
    %cst = arith.constant dense<0.000000e+00> : vector<8x32xf32>
    %3 = tpu.matmul %1, %2, %cst {dimension_numbers = #tpu.dot_dimension_numbers<[1], [0], [0], [1], [0, 0, 1, 1], [], []>} : vector<8x32xbf16>, vector<32x32xbf16>, vector<8x32xf32> -> vector<8x32xf32>
    %c0_3 = arith.constant 0 : index
    %c0_4 = arith.constant 0 : index
    %4 = vector.load %arg3[%c0_3, %c0_4] : memref<1x32xf32, #tpu.memory_space<vmem>>, vector<1x32xf32>
    %5 = vector.broadcast %4 : vector<1x32xf32> to vector<8x32xf32>
    %6 = arith.addf %3, %5 : vector<8x32xf32>
    %cst_5 = arith.constant 0.000000e+00 : f32
    %7 = vector.broadcast %cst_5 : f32 to vector<8x32xf32>
    %8 = arith.maximumf %6, %7 : vector<8x32xf32>
    %9 = arith.truncf %8 : vector<8x32xf32> to vector<8x32xbf16>
    %c0_6 = arith.constant 0 : index
    %c0_7 = arith.constant 0 : index
    %10 = vector.load %arg4[%c0_6, %c0_7] : memref<32x128xbf16, #tpu.memory_space<vmem>>, vector<32x128xbf16>
    %cst_8 = arith.constant dense<0.000000e+00> : vector<8x128xf32>
    %11 = tpu.matmul %9, %10, %cst_8 {dimension_numbers = #tpu.dot_dimension_numbers<[1], [0], [0], [1], [0, 0, 1, 1], [], []>} : vector<8x32xbf16>, vector<32x128xbf16>, vector<8x128xf32> -> vector<8x128xf32>
    %c0_9 = arith.constant 0 : index
    %c0_10 = arith.constant 0 : index
    %12 = vector.load %arg5[%c0_9, %c0_10] : memref<1x128xf32, #tpu.memory_space<vmem>>, vector<1x128xf32>
    %13 = vector.broadcast %12 : vector<1x128xf32> to vector<8x128xf32>
    %14 = arith.addf %11, %13 : vector<8x128xf32>
    %cst_11 = arith.constant dense<0xFF800000> : vector<8xf32>
    %15 = vector.multi_reduction <maximumf>, %14, %cst_11 [1] : vector<8x128xf32> to vector<8xf32>
    %16 = vector.shape_cast %15 : vector<8xf32> to vector<8x1xf32>
    %17 = vector.broadcast %16 : vector<8x1xf32> to vector<8x128xf32>
    %18 = arith.subf %14, %17 : vector<8x128xf32>
    %19 = math.exp %18 : vector<8x128xf32>
    %cst_12 = arith.constant dense<0.000000e+00> : vector<8xf32>
    %20 = vector.multi_reduction <add>, %19, %cst_12 [1] : vector<8x128xf32> to vector<8xf32>
    %21 = vector.shape_cast %20 : vector<8xf32> to vector<8x1xf32>
    %22 = tpu.reciprocal %21 {approx = true} : vector<8x1xf32> -> vector<8x1xf32>
    %23 = vector.broadcast %22 : vector<8x1xf32> to vector<8x128xf32>
    %24 = arith.mulf %19, %23 : vector<8x128xf32>
    %c0_13 = arith.constant 0 : index
    %c0_14 = arith.constant 0 : index
    %25 = vector.load %arg6[%c0_13, %c0_14] : memref<8x128xf32, #tpu.memory_space<vmem>>, vector<8x128xf32>
    tpu.vector_store %arg6[%c0_13, %c0_14], %24 {strides = array<i32>} : memref<8x128xf32, #tpu.memory_space<vmem>>, vector<8x128xf32>,
    return
  }
  func.func @transform_0(%arg0: i32) -> (i32, i32) {
    %c0_i32 = arith.constant 0 : i32
    %c0_i32_0 = arith.constant 0 : i32
    return %arg0, %c0_i32 : i32, i32
  }
  func.func @transform_1(%arg0: i32) -> (i32, i32) {
    %c0_i32 = arith.constant 0 : i32
    %c0_i32_0 = arith.constant 0 : i32
    %c0_i32_1 = arith.constant 0 : i32
    return %c0_i32, %c0_i32_0 : i32, i32
  }
  func.func @transform_2(%arg0: i32) -> (i32, i32) {
    %c0_i32 = arith.constant 0 : i32
    %c0_i32_0 = arith.constant 0 : i32
    %c0_i32_1 = arith.constant 0 : i32
    return %c0_i32, %c0_i32_0 : i32, i32
  }
  func.func @transform_3(%arg0: i32) -> (i32, i32) {
    %c0_i32 = arith.constant 0 : i32
    %c0_i32_0 = arith.constant 0 : i32
    %c0_i32_1 = arith.constant 0 : i32
    return %c0_i32, %c0_i32_0 : i32, i32
  }
  func.func @transform_4(%arg0: i32) -> (i32, i32) {
    %c0_i32 = arith.constant 0 : i32
    %c0_i32_0 = arith.constant 0 : i32
    %c0_i32_1 = arith.constant 0 : i32
    return %c0_i32, %c0_i32_0 : i32, i32
  }
  func.func @transform_5(%arg0: i32) -> (i32, i32) {
    %c0_i32 = arith.constant 0 : i32
    %c0_i32_0 = arith.constant 0 : i32
    return %arg0, %c0_i32 : i32, i32
  }
}

module attributes {stable_mosaic.version = 11 : i64} {
  func.func @mlp_kernel(%arg0: i32, %arg1: memref<8x32xf32, #tpu.memory_space<vmem>>, %arg2: memref<32x32xbf16, #tpu.memory_space<vmem>>, %arg3: memref<1x32xf32, #tpu.memory_space<vmem>>, %arg4: memref<32x128xbf16, #tpu.memory_space<vmem>>, %arg5: memref<1x128xf32, #tpu.memory_space<vmem>>, %arg6: memref<8x128xf32, #tpu.memory_space<vmem>>) attributes {dimension_semantics = [#tpu.dimension_semantics<parallel>], iteration_bounds = array<i64: 1>, scalar_prefetch = 0 : i64, scratch_operands = 0 : i64, tpu.core_type = #tpu.core_type<tc>, window_params = [{transform_indices = @transform_0, window_bounds = array<i64: 8, 32>}, {pipeline_mode = #tpu.pipeline_mode<synchronous>, transform_indices = @transform_1, window_bounds = array<i64: 32, 32>}, {pipeline_mode = #tpu.pipeline_mode<synchronous>, transform_indices = @transform_2, window_bounds = array<i64: 1, 32>}, {pipeline_mode = #tpu.pipeline_mode<synchronous>, transform_indices = @transform_3, window_bounds = array<i64: 32, 128>}, {pipeline_mode = #tpu.pipeline_mode<synchronous>, transform_indices = @transform_4, window_bounds = array<i64: 1, 128>}, {transform_indices = @transform_5, window_bounds = array<i64: 8, 128>}]} {
    %c0 = arith.constant 0 : index
    %c0_0 = arith.constant 0 : index
    %0 = vector.load %arg1[%c0, %c0_0] : memref<8x32xf32, #tpu.memory_space<vmem>>, vector<8x32xf32>
    %1 = arith.truncf %0 : vector<8x32xf32> to vector<8x32xbf16>
    %c0_1 = arith.constant 0 : index
    %c0_2 = arith.constant 0 : index
    %2 = vector.load %arg2[%c0_1, %c0_2] : memref<32x32xbf16, #tpu.memory_space<vmem>>, vector<32x32xbf16>
    %cst = arith.constant dense<0.000000e+00> : vector<8x32xf32>
    %3 = tpu.matmul %1, %2, %cst {dimension_numbers = #tpu.dot_dimension_numbers<[1], [0], [0], [1], [0, 0, 1, 1], [], []>} : vector<8x32xbf16>, vector<32x32xbf16>, vector<8x32xf32> -> vector<8x32xf32>
    %c0_3 = arith.constant 0 : index
    %c0_4 = arith.constant 0 : index
    %4 = vector.load %arg3[%c0_3, %c0_4] : memref<1x32xf32, #tpu.memory_space<vmem>>, vector<1x32xf32>
    %5 = vector.broadcast %4 : vector<1x32xf32> to vector<8x32xf32>
    %6 = arith.addf %3, %5 : vector<8x32xf32>
    %cst_5 = arith.constant 0.000000e+00 : f32
    %7 = vector.broadcast %cst_5 : f32 to vector<8x32xf32>
    %8 = arith.maximumf %6, %7 : vector<8x32xf32>
    %9 = arith.truncf %8 : vector<8x32xf32> to vector<8x32xbf16>
    %c0_6 = arith.constant 0 : index
    %c0_7 = arith.constant 0 : index
    %10 = vector.load %arg4[%c0_6, %c0_7] : memref<32x128xbf16, #tpu.memory_space<vmem>>, vector<32x128xbf16>
    %cst_8 = arith.constant dense<0.000000e+00> : vector<8x128xf32>
    %11 = tpu.matmul %9, %10, %cst_8 {dimension_numbers = #tpu.dot_dimension_numbers<[1], [0], [0], [1], [0, 0, 1, 1], [], []>} : vector<8x32xbf16>, vector<32x128xbf16>, vector<8x128xf32> -> vector<8x128xf32>
    %c0_9 = arith.constant 0 : index
    %c0_10 = arith.constant 0 : index
    %12 = vector.load %arg5[%c0_9, %c0_10] : memref<1x128xf32, #tpu.memory_space<vmem>>, vector<1x128xf32>
    %13 = vector.broadcast %12 : vector<1x128xf32> to vector<8x128xf32>
    %14 = arith.addf %11, %13 : vector<8x128xf32>
    %cst_11 = arith.constant dense<0xFF800000> : vector<8xf32>
    %15 = vector.multi_reduction <maximumf>, %14, %cst_11 [1] : vector<8x128xf32> to vector<8xf32>
    %16 = vector.shape_cast %15 : vector<8xf32> to vector<8x1xf32>
    %17 = vector.broadcast %16 : vector<8x1xf32> to vector<8x128xf32>
    %18 = arith.subf %14, %17 : vector<8x128xf32>
    %19 = math.exp %18 : vector<8x128xf32>
    %cst_12 = arith.constant dense<0.000000e+00> : vector<8xf32>
    %20 = vector.multi_reduction <add>, %19, %cst_12 [1] : vector<8x128xf32> to vector<8xf32>
    %21 = vector.shape_cast %20 : vector<8xf32> to vector<8x1xf32>
    %22 = tpu.reciprocal %21 {approx = true} : vector<8x1xf32> -> vector<8x1xf32>
    %23 = vector.broadcast %22 : vector<8x1xf32> to vector<8x128xf32>
    %24 = arith.mulf %19, %23 : vector<8x128xf32>
    %c0_13 = arith.constant 0 : index
    %c0_14 = arith.constant 0 : index
    %25 = vector.load %arg6[%c0_13, %c0_14] : memref<8x128xf32, #tpu.memory_space<vmem>>, vector<8x128xf32>
    tpu.vector_store %arg6[%c0_13, %c0_14], %24 {strides = array<i32>} : memref<8x128xf32, #tpu.memory_space<vmem>>, vector<8x128xf32>,
    return
  }
  func.func @transform_0(%arg0: i32) -> (i32, i32) {
    %c0_i32 = arith.constant 0 : i32
    %c0_i32_0 = arith.constant 0 : i32
    return %arg0, %c0_i32 : i32, i32
  }
  func.func @transform_1(%arg0: i32) -> (i32, i32) {
    %c0_i32 = arith.constant 0 : i32
    %c0_i32_0 = arith.constant 0 : i32
    %c0_i32_1 = arith.constant 0 : i32
    return %c0_i32, %c0_i32_0 : i32, i32
  }
  func.func @transform_2(%arg0: i32) -> (i32, i32) {
    %c0_i32 = arith.constant 0 : i32
    %c0_i32_0 = arith.constant 0 : i32
    %c0_i32_1 = arith.constant 0 : i32
    return %c0_i32, %c0_i32_0 : i32, i32
  }
  func.func @transform_3(%arg0: i32) -> (i32, i32) {
    %c0_i32 = arith.constant 0 : i32
    %c0_i32_0 = arith.constant 0 : i32
    %c0_i32_1 = arith.constant 0 : i32
    return %c0_i32, %c0_i32_0 : i32, i32
  }
  func.func @transform_4(%arg0: i32) -> (i32, i32) {
    %c0_i32 = arith.constant 0 : i32
    %c0_i32_0 = arith.constant 0 : i32
    %c0_i32_1 = arith.constant 0 : i32
    return %c0_i32, %c0_i32_0 : i32, i32
  }
  func.func @transform_5(%arg0: i32) -> (i32, i32) {
    %c0_i32 = arith.constant 0 : i32
    %c0_i32_0 = arith.constant 0 : i32
    return %arg0, %c0_i32 : i32, i32
  }
}

</mosaic_0001>

<bundles_post_ra>
// kernel: tpu_custom_call.1
= control target key start
LH: loop header
LB: loop body
LE: loop exit
PB: predicated region body
PF: predicated region fallthrough
CT: control target
= control target key end

     0   :  { %10 = vsyncpa [#allocation3], 0  ;;  %s462_s0 = inlined_call_operand.hbm [shape: f32[8,32], index: 0, kind: input, shape index: {}]   ;;  %s463_s1 = inlined_call_operand.hbm [shape: bf16[32,32], index: 1, kind: input, shape index: {}]   ;;  %s464_s2 = inlined_call_operand.vmem [shape: f32[1,32], index: 2, kind: input, shape index: {}]   ;;  %s465_s3 = inlined_call_operand.hbm [shape: bf16[32,128], index: 3, kind: input, shape index: {}]   ;;  %s466_s4 = inlined_call_operand.vmem [shape: f32[1,128], index: 4, kind: input, shape index: {}]   ;;  %s467_s5 = inlined_call_operand.hbm [shape: f32[8,128], index: 5, kind: output, shape index: {}]  }
   0x1   :  { %11 = vsyncpa [#allocation6], 0 }
   0x2   :  { %12 = vsyncpa [#allocation4], 0  ;;  %s364_s18 = smov [#allocation5]   ;;  %s270_s22 = scalar_lea.hbm %s463_s1, 256 }
   0x3   :  { %s28_s19 = sshll.u32 %s364_s18, 4  ;;  %p271_p0 = scmp.ne.s32.totalorder %s463_s1, %s270_s22  ;;  %s29_s19 = int_to_ptr.vmem [resolvable:$true] %s28_s19 }
   0x4   :  { %p274_p1 = scmp.lt.u32.totalorder %s270_s22, %s463_s1 }
   0x6   :  { %p276_p2 = pnand %p274_p1, %p271_p0 }
   0x8   :  { %279 = shalt.err (!%p276_p2)
}
   0x9   :  { %s280_s27 = scalar_lea.vmem %s29_s19, 256  ;;  %p285_p4 = scmp.lt.s32.totalorder %s29_s19, %s29_s19 }
   0xa   :  { %p281_p3 = scmp.ne.s32.totalorder %s29_s19, %s280_s27  ;;  %p286_p5 = scmp.lt.s32.totalorder %s280_s27, %s280_s27 }
   0xc   :  { %p287_p6 = por %p286_p5, %p285_p4 }
   0xe   :  { %p288_p7 = pnand %p287_p6, %p281_p3 }
  0x10   :  { %291 = shalt.err (!%p288_p7)
}
  0x11   :  { %s365_s28 = smov 64   ;;  %s366_s29 = smov 4  }
  0x12   :  { %34 = dma.hbm_to_vmem [thread:$0]  %s463_s1, 256, %s29_s19, [#allocation6], %s365_s28, %s365_s28, %s366_s29  }
  0x13   :  { %s367_s7 = smov [#allocation2]   ;;  %s368_s9 = smov [#allocation7]  }
  0x14   :  { %s19_s8 = sshll.u32 %s367_s7, 4  ;;  %s42_s10 = sshll.u32 %s368_s9, 4  ;;  %s20_s8 = int_to_ptr.vmem [resolvable:$true] %s19_s8  ;;  %s43_s10 = int_to_ptr.vmem [resolvable:$true] %s42_s10 }
  0x15   :  { %s292_s13 = scalar_lea.hbm %s462_s0, 128 }
  0x16   :  { %p293_p8 = scmp.ne.s32.totalorder %s462_s0, %s292_s13  ;;  %p296_p9 = scmp.lt.u32.totalorder %s292_s13, %s462_s0 }
  0x18   :  { %p298_p10 = pnand %p296_p9, %p293_p8 }
  0x1a   :  { %301 = shalt.err (!%p298_p10)
}
  0x1b   :  { %s302_s1 = scalar_lea.vmem %s20_s8, 128  ;;  %p307_p12 = scmp.lt.s32.totalorder %s20_s8, %s20_s8 }
  0x1c   :  { %p303_p11 = scmp.ne.s32.totalorder %s20_s8, %s302_s1  ;;  %p308_p13 = scmp.lt.s32.totalorder %s302_s1, %s302_s1 }
  0x1e   :  { %p309_p0 = por %p308_p13, %p307_p12 }
  0x20   :  { %p310_p1 = pnand %p309_p0, %p303_p11 }
  0x22   :  { %313 = shalt.err (!%p310_p1)
}
  0x23   :  { %22 = dma.hbm_to_vmem [thread:$0]  %s462_s0, 128, %s20_s8, [#allocation3]  }
  0x24   :  { %s314_s22 = scalar_lea.hbm %s465_s3, 256 }
  0x25   :  { %p315_p2 = scmp.ne.s32.totalorder %s465_s3, %s314_s22  ;;  %p318_p3 = scmp.lt.u32.totalorder %s314_s22, %s465_s3 }
  0x27   :  { %p320_p4 = pnand %p318_p3, %p315_p2 }
  0x29   :  { %323 = shalt.err (!%p320_p4)
}
  0x2a   :  { %s324_s27 = scalar_lea.vmem %s43_s10, 256  ;;  %p329_p6 = scmp.lt.s32.totalorder %s43_s10, %s43_s10 }
  0x2b   :  { %p325_p5 = scmp.ne.s32.totalorder %s43_s10, %s324_s27  ;;  %p330_p7 = scmp.lt.s32.totalorder %s324_s27, %s324_s27 }
  0x2d   :  { %p331_p8 = por %p330_p7, %p329_p6 }
  0x2f   :  { %p332_p9 = pnand %p331_p8, %p325_p5 }
  0x31   :  { %335 = shalt.err (!%p332_p9)
}
  0x32   :  { %48 = dma.hbm_to_vmem [thread:$0]  %s465_s3, 256, %s43_s10, [#allocation6], %s365_s28, %s365_s28, %s366_s29  }
  0x33   :  { %358 = dma.done.wait [#allocation3], 128  }
  0x34   :  { %359 = vsyncadd [#allocation3], 4294967168 }
  0x35   :  { %360 = dma.done.wait [#allocation6], 512  }
  0x36   :  { %361 = vsyncadd [#allocation6], 4294966784  ;;  %v369_v0 = vmov 0.0   ;;  %vm370_vm0 = vmmov 0   ;;  %v262_v1 = vld [vmem:[#allocation5] sm:$0xff]   ;;  %v263_v2 = vld [vmem:[#allocation5 + $0x8] sm:$0xff]  }
  0x37   :  { %238 = vmatprep.subr.bf16.mxu0 %v369_v0  ;;  %242 = vmatprep.mubr.msk.bf16.mxu0 %vm370_vm0, %v369_v0  ;;  %v61_v3 = vld [vmem:[#allocation2] sm:$0xff]  ;;  %vm86_vm1 = vcmask 261120   ;;  %v264_v5 = vld [vmem:[#allocation7] sm:$0xff]  }
  0x38   :  { %246 = vmatprep.subr.bf16.mxu1 %v369_v0  ;;  %250 = vmatprep.mubr.msk.bf16.mxu1 %vm370_vm0, %v369_v0  ;;  %v62_v4 = vpack.c.bf16 %v61_v3, %v61_v3  ;;  %v265_v6 = vld [vmem:[#allocation7 + $0x8] sm:$0xff]  }
  0x39   :  { %239 = vmatpush3.bf16.msra.mxu0 %v262_v1  ;;  %247 = vmatpush3.bf16.msra.mxu1 %v264_v5  ;;  %v224_v7 = vld [vmem:[%s464_s2] ss:$0 sm:$0xff]  ;;  %s371_s2 = smov [#allocation8]  }
  0x3a   :  { %240 = vmatprep.subr.bf16.mxu0 %v369_v0  ;;  %248 = vmatprep.subr.bf16.mxu1 %v369_v0  ;;  %v228_v15 = vld [vmem:[%s466_s4] ss:$0 sm:$0xff]  ;;  %s214_s7 = sshll.u32 %s371_s2, 4  ;;  %s215_s7 = int_to_ptr.vmem [resolvable:$true] %s214_s7 }
  0x3b   :  { %s336_s4 = scalar_lea.vmem %s215_s7, 128  ;;  %p341_p11 = scmp.lt.s32.totalorder %s215_s7, %s215_s7 }
  0x3c   :  { %p337_p10 = scmp.ne.s32.totalorder %s215_s7, %s336_s4  ;;  %p342_p12 = scmp.lt.s32.totalorder %s336_s4, %s336_s4 }
  0x3d   :  { %241 = vmatpush3.bf16.msra.mxu0 %v263_v2  ;;  %249 = vmatpush3.bf16.msra.mxu1 %v265_v6 }
  0x3e   :  { %p343_p13 = por %p342_p12, %p341_p11 }
  0x40   :  { %243 = vmatmul.mubr.msk.bf16.vlgmr.msra.gmra.mrb[0].mxu0 %vm86_vm1, %v62_v4  ;;  %p344_p0 = pnand %p343_p13, %p337_p10 }
 0x113   :  { %v124_v8 = vpop.f32.mrb[0].mxu0 }
 0x114   :  { %v125_v9 = vadd.f32 %v224_v7, %v124_v8  ;;  %v244_v10 = vpop.f32.mrb[1].mxu0 }
 0x115   :  { %v127_v11 = vpop.f32.mrb[2].mxu0 }
 0x116   :  { %v130_v12 = vmax.f32 %v125_v9, 0.0  ;;  %v245_v13 = vpop.f32.mrb[3].mxu0 }
 0x118   :  { %v131_v14 = vpack.c.bf16 %v130_v12, %v130_v12 }
 0x11a   :  { %251 = vmatmul.mubr.msk.bf16.vlgmr.msra.gmra.mrb[0].mxu1 %vm86_vm1, %v131_v14 }
 0x1ed   :  { %v192_v16 = vpop.f32.mrb[0].mxu1 }
 0x1ee   :  { %v193_v17 = vadd.f32 %v228_v15, %v192_v16  ;;  %v252_v18 = vpop.f32.mrb[1].mxu1 }
 0x1ef   :  { %v195_v19 = vpop.f32.mrb[2].mxu1 }
 0x1f0   :  { %198 = vmax.xlane.f32.xlu0 %v193_v17  ;;  %v253_v20 = vpop.f32.mrb[3].mxu1 }
 0x27d   :  { %v199_v21 = vpop.xlane.xlu0 %198 }
 0x27e   :  { %v200_v22 = vsub.f32 %v193_v17, %v199_v21 }
 0x280   :  { %v201_v23 = vmul.f32 1.442695, %v200_v22 }
 0x282   :  { %266 = vpow2.f32 %v201_v23 }
 0x28c   :  { %v267_v24 = vpop.eup %266 }
 0x28d   :  { %203 = vadd.xlane.f32.xlu0 %v267_v24 }
 0x31a   :  { %v204_v25 = vpop.xlane.xlu0 %203 }
 0x31b   :  { %268 = vrcp.f32 %v204_v25 }
 0x325   :  { %v269_v26 = vpop.eup %268 }
 0x326   :  { %v206_v27 = vmul.f32 %v269_v26, %v267_v24 }
 0x328   :  { %207 = vst [vmem:[#allocation8] sm:$0xff] %v206_v27 }
 0x329   :  { %347 = shalt.err (!%p344_p0)
}
 0x32a   :  { %s348_s10 = scalar_lea.hbm %s467_s5, 128 }
 0x32b   :  { %p349_p1 = scmp.ne.s32.totalorder %s467_s5, %s348_s10  ;;  %p352_p2 = scmp.lt.u32.totalorder %s348_s10, %s467_s5 }
 0x32d   :  { %p354_p3 = pnand %p352_p2, %p349_p1 }
 0x32f   :  { %357 = shalt.err (!%p354_p3)
}
 0x330   :  { %217 = dma.vmem_to_hbm [thread:$0]  %s215_s7, 128, %s467_s5, [#allocation4]  }
 0x331   :  { %362 = dma.done.wait [#allocation4], 128  }
 0x332   :  { %363 = vsyncadd [#allocation4], 4294967168 }
 0x333   :  { %221 = vsyncpa [#allocation3], 1 }
 0x334   :  { %222 = vsyncpa [#allocation6], 1 }
 0x335   :  { %223 = vsyncpa [#allocation4], 1 }

// kernel: tpu_custom_call.1
= control target key start
LH: loop header
LB: loop body
LE: loop exit
PB: predicated region body
PF: predicated region fallthrough
CT: control target
= control target key end

     0   :  { %10 = vsyncpa [#allocation3], 0  ;;  %s462_s0 = inlined_call_operand.hbm [shape: f32[8,32], index: 0, kind: input, shape index: {}]   ;;  %s463_s1 = inlined_call_operand.hbm [shape: bf16[32,32], index: 1, kind: input, shape index: {}]   ;;  %s464_s2 = inlined_call_operand.vmem [shape: f32[1,32], index: 2, kind: input, shape index: {}]   ;;  %s465_s3 = inlined_call_operand.hbm [shape: bf16[32,128], index: 3, kind: input, shape index: {}]   ;;  %s466_s4 = inlined_call_operand.vmem [shape: f32[1,128], index: 4, kind: input, shape index: {}]   ;;  %s467_s5 = inlined_call_operand.hbm [shape: f32[8,128], index: 5, kind: output, shape index: {}]  }
   0x1   :  { %11 = vsyncpa [#allocation6], 0 }
   0x2   :  { %12 = vsyncpa [#allocation4], 0  ;;  %s364_s18 = smov [#allocation5]   ;;  %s270_s22 = scalar_lea.hbm %s463_s1, 256 }
   0x3   :  { %s28_s19 = sshll.u32 %s364_s18, 4  ;;  %p271_p0 = scmp.ne.s32.totalorder %s463_s1, %s270_s22  ;;  %s29_s19 = int_to_ptr.vmem [resolvable:$true] %s28_s19 }
   0x4   :  { %p274_p1 = scmp.lt.u32.totalorder %s270_s22, %s463_s1 }
   0x6   :  { %p276_p2 = pnand %p274_p1, %p271_p0 }
   0x8   :  { %279 = shalt.err (!%p276_p2)
}
   0x9   :  { %s280_s27 = scalar_lea.vmem %s29_s19, 256  ;;  %p285_p4 = scmp.lt.s32.totalorder %s29_s19, %s29_s19 }
   0xa   :  { %p281_p3 = scmp.ne.s32.totalorder %s29_s19, %s280_s27  ;;  %p286_p5 = scmp.lt.s32.totalorder %s280_s27, %s280_s27 }
   0xc   :  { %p287_p6 = por %p286_p5, %p285_p4 }
   0xe   :  { %p288_p7 = pnand %p287_p6, %p281_p3 }
  0x10   :  { %291 = shalt.err (!%p288_p7)
}
  0x11   :  { %s365_s28 = smov 64   ;;  %s366_s29 = smov 4  }
  0x12   :  { %34 = dma.hbm_to_vmem [thread:$0]  %s463_s1, 256, %s29_s19, [#allocation6], %s365_s28, %s365_s28, %s366_s29  }
  0x13   :  { %s367_s7 = smov [#allocation2]   ;;  %s368_s9 = smov [#allocation7]  }
  0x14   :  { %s19_s8 = sshll.u32 %s367_s7, 4  ;;  %s42_s10 = sshll.u32 %s368_s9, 4  ;;  %s20_s8 = int_to_ptr.vmem [resolvable:$true] %s19_s8  ;;  %s43_s10 = int_to_ptr.vmem [resolvable:$true] %s42_s10 }
  0x15   :  { %s292_s13 = scalar_lea.hbm %s462_s0, 128 }
  0x16   :  { %p293_p8 = scmp.ne.s32.totalorder %s462_s0, %s292_s13  ;;  %p296_p9 = scmp.lt.u32.totalorder %s292_s13, %s462_s0 }
  0x18   :  { %p298_p10 = pnand %p296_p9, %p293_p8 }
  0x1a   :  { %301 = shalt.err (!%p298_p10)
}
  0x1b   :  { %s302_s1 = scalar_lea.vmem %s20_s8, 128  ;;  %p307_p12 = scmp.lt.s32.totalorder %s20_s8, %s20_s8 }
  0x1c   :  { %p303_p11 = scmp.ne.s32.totalorder %s20_s8, %s302_s1  ;;  %p308_p13 = scmp.lt.s32.totalorder %s302_s1, %s302_s1 }
  0x1e   :  { %p309_p0 = por %p308_p13, %p307_p12 }
  0x20   :  { %p310_p1 = pnand %p309_p0, %p303_p11 }
  0x22   :  { %313 = shalt.err (!%p310_p1)
}
  0x23   :  { %22 = dma.hbm_to_vmem [thread:$0]  %s462_s0, 128, %s20_s8, [#allocation3]  }
  0x24   :  { %s314_s22 = scalar_lea.hbm %s465_s3, 256 }
  0x25   :  { %p315_p2 = scmp.ne.s32.totalorder %s465_s3, %s314_s22  ;;  %p318_p3 = scmp.lt.u32.totalorder %s314_s22, %s465_s3 }
  0x27   :  { %p320_p4 = pnand %p318_p3, %p315_p2 }
  0x29   :  { %323 = shalt.err (!%p320_p4)
}
  0x2a   :  { %s324_s27 = scalar_lea.vmem %s43_s10, 256  ;;  %p329_p6 = scmp.lt.s32.totalorder %s43_s10, %s43_s10 }
  0x2b   :  { %p325_p5 = scmp.ne.s32.totalorder %s43_s10, %s324_s27  ;;  %p330_p7 = scmp.lt.s32.totalorder %s324_s27, %s324_s27 }
  0x2d   :  { %p331_p8 = por %p330_p7, %p329_p6 }
  0x2f   :  { %p332_p9 = pnand %p331_p8, %p325_p5 }
  0x31   :  { %335 = shalt.err (!%p332_p9)
}
  0x32   :  { %48 = dma.hbm_to_vmem [thread:$0]  %s465_s3, 256, %s43_s10, [#allocation6], %s365_s28, %s365_s28, %s366_s29  }
  0x33   :  { %358 = dma.done.wait [#allocation3], 128  }
  0x34   :  { %359 = vsyncadd [#allocation3], 4294967168 }
  0x35   :  { %360 = dma.done.wait [#allocation6], 512  }
  0x36   :  { %361 = vsyncadd [#allocation6], 4294966784  ;;  %v369_v0 = vmov 0.0   ;;  %vm370_vm0 = vmmov 0   ;;  %v262_v1 = vld [vmem:[#allocation5] sm:$0xff]   ;;  %v263_v2 = vld [vmem:[#allocation5 + $0x8] sm:$0xff]  }
  0x37   :  { %238 = vmatprep.subr.bf16.mxu0 %v369_v0  ;;  %242 = vmatprep.mubr.msk.bf16.mxu0 %vm370_vm0, %v369_v0  ;;  %v61_v3 = vld [vmem:[#allocation2] sm:$0xff]  ;;  %vm86_vm1 = vcmask 261120   ;;  %v264_v5 = vld [vmem:[#allocation7] sm:$0xff]  }
  0x38   :  { %246 = vmatprep.subr.bf16.mxu1 %v369_v0  ;;  %250 = vmatprep.mubr.msk.bf16.mxu1 %vm370_vm0, %v369_v0  ;;  %v62_v4 = vpack.c.bf16 %v61_v3, %v61_v3  ;;  %v265_v6 = vld [vmem:[#allocation7 + $0x8] sm:$0xff]  }
  0x39   :  { %239 = vmatpush3.bf16.msra.mxu0 %v262_v1  ;;  %247 = vmatpush3.bf16.msra.mxu1 %v264_v5  ;;  %v224_v7 = vld [vmem:[%s464_s2] ss:$0 sm:$0xff]  ;;  %s371_s2 = smov [#allocation8]  }
  0x3a   :  { %240 = vmatprep.subr.bf16.mxu0 %v369_v0  ;;  %248 = vmatprep.subr.bf16.mxu1 %v369_v0  ;;  %v228_v15 = vld [vmem:[%s466_s4] ss:$0 sm:$0xff]  ;;  %s214_s7 = sshll.u32 %s371_s2, 4  ;;  %s215_s7 = int_to_ptr.vmem [resolvable:$true] %s214_s7 }
  0x3b   :  { %s336_s4 = scalar_lea.vmem %s215_s7, 128  ;;  %p341_p11 = scmp.lt.s32.totalorder %s215_s7, %s215_s7 }
  0x3c   :  { %p337_p10 = scmp.ne.s32.totalorder %s215_s7, %s336_s4  ;;  %p342_p12 = scmp.lt.s32.totalorder %s336_s4, %s336_s4 }
  0x3d   :  { %241 = vmatpush3.bf16.msra.mxu0 %v263_v2  ;;  %249 = vmatpush3.bf16.msra.mxu1 %v265_v6 }
  0x3e   :  { %p343_p13 = por %p342_p12, %p341_p11 }
  0x40   :  { %243 = vmatmul.mubr.msk.bf16.vlgmr.msra.gmra.mrb[0].mxu0 %vm86_vm1, %v62_v4  ;;  %p344_p0 = pnand %p343_p13, %p337_p10 }
 0x113   :  { %v124_v8 = vpop.f32.mrb[0].mxu0 }
 0x114   :  { %v125_v9 = vadd.f32 %v224_v7, %v124_v8  ;;  %v244_v10 = vpop.f32.mrb[1].mxu0 }
 0x115   :  { %v127_v11 = vpop.f32.mrb[2].mxu0 }
 0x116   :  { %v130_v12 = vmax.f32 %v125_v9, 0.0  ;;  %v245_v13 = vpop.f32.mrb[3].mxu0 }
 0x118   :  { %v131_v14 = vpack.c.bf16 %v130_v12, %v130_v12 }
 0x11a   :  { %251 = vmatmul.mubr.msk.bf16.vlgmr.msra.gmra.mrb[0].mxu1 %vm86_vm1, %v131_v14 }
 0x1ed   :  { %v192_v16 = vpop.f32.mrb[0].mxu1 }
 0x1ee   :  { %v193_v17 = vadd.f32 %v228_v15, %v192_v16  ;;  %v252_v18 = vpop.f32.mrb[1].mxu1 }
 0x1ef   :  { %v195_v19 = vpop.f32.mrb[2].mxu1 }
 0x1f0   :  { %198 = vmax.xlane.f32.xlu0 %v193_v17  ;;  %v253_v20 = vpop.f32.mrb[3].mxu1 }
 0x27d   :  { %v199_v21 = vpop.xlane.xlu0 %198 }
 0x27e   :  { %v200_v22 = vsub.f32 %v193_v17, %v199_v21 }
 0x280   :  { %v201_v23 = vmul.f32 1.442695, %v200_v22 }
 0x282   :  { %266 = vpow2.f32 %v201_v23 }
 0x28c   :  { %v267_v24 = vpop.eup %266 }
 0x28d   :  { %203 = vadd.xlane.f32.xlu0 %v267_v24 }
 0x31a   :  { %v204_v25 = vpop.xlane.xlu0 %203 }
 0x31b   :  { %268 = vrcp.f32 %v204_v25 }
 0x325   :  { %v269_v26 = vpop.eup %268 }
 0x326   :  { %v206_v27 = vmul.f32 %v269_v26, %v267_v24 }
 0x328   :  { %207 = vst [vmem:[#allocation8] sm:$0xff] %v206_v27 }
 0x329   :  { %347 = shalt.err (!%p344_p0)
}
 0x32a   :  { %s348_s10 = scalar_lea.hbm %s467_s5, 128 }
 0x32b   :  { %p349_p1 = scmp.ne.s32.totalorder %s467_s5, %s348_s10  ;;  %p352_p2 = scmp.lt.u32.totalorder %s348_s10, %s467_s5 }
 0x32d   :  { %p354_p3 = pnand %p352_p2, %p349_p1 }
 0x32f   :  { %357 = shalt.err (!%p354_p3)
}
 0x330   :  { %217 = dma.vmem_to_hbm [thread:$0]  %s215_s7, 128, %s467_s5, [#allocation4]  }
 0x331   :  { %362 = dma.done.wait [#allocation4], 128  }
 0x332   :  { %363 = vsyncadd [#allocation4], 4294967168 }
 0x333   :  { %221 = vsyncpa [#allocation3], 1 }
 0x334   :  { %222 = vsyncpa [#allocation6], 1 }
 0x335   :  { %223 = vsyncpa [#allocation4], 1 }

</bundles_post_ra>
